<compile_context>
chip_gen: v7x
topology: tpu7x:2x2x1
jax: 0.10.0
libtpu: 0.0.40
codegen_flags: <defaults>
</compile_context>

<pallas_src>
import functools

import jax
import jax.numpy as jnp
from jax import lax
from jax.experimental import pallas as pl
from jax.experimental.pallas import tpu as pltpu

EPS = 1e-5


def _residual_kernel(x_ref, w_ref, gb_ref, out_ref, *, out_features, in_features):
    # Whole problem lives in one VMEM tile: MXU matmul, BN reduction over the
    # batch (sublane) axis, ReLU, and a single lane-dense full-tile store of
    # [relu(bn) | x | zero-pad].
    x_orig = x_ref[...]                               # (B, I), output-dtype passthrough
    x = x_orig.astype(jnp.float32)                    # (B, I)
    w = w_ref[...].astype(jnp.float32)                # (I, O)
    gb = gb_ref[...].astype(jnp.float32)              # (2, O): row 0 = gamma, row 1 = beta
    gamma = gb[0:1, :]                                # (1, O)
    beta = gb[1:2, :]                                 # (1, O)

    # Linear bias omitted on purpose: BatchNorm (training mode) subtracts the
    # batch mean of h, so the bias cancels exactly.
    h = jnp.dot(x, w, preferred_element_type=jnp.float32)         # (B, O)

    # BatchNorm1d, training mode: batch mean / biased batch variance per feature.
    mean = jnp.mean(h, axis=0, keepdims=True)                      # (1, O)
    centered = h - mean                                            # (B, O)
    var = jnp.mean(centered * centered, axis=0, keepdims=True)     # (1, O)
    scale = gamma * lax.rsqrt(var + EPS)                           # (1, O), EUP rsqrt
    bn = centered * scale + beta                                   # (B, O)

    y = jnp.maximum(bn, 0.0)                                       # ReLU

    # Single full-width store: [relu(bn) | x | zero padding to a 128 multiple].
    pad = out_ref.shape[1] - (out_features + in_features)
    pieces = [y.astype(out_ref.dtype), x_orig.astype(out_ref.dtype)]
    if pad > 0:
        pieces.append(jnp.zeros((x_orig.shape[0], pad), dtype=out_ref.dtype))
    out_ref[...] = jnp.concatenate(pieces, axis=1)


def residual_forward(x, w, b, gamma, beta):
    """x: (B, I) f32; w: (O, I) PyTorch-layout Linear weight; b, gamma, beta: (O,).

    `b` is accepted for API parity with the PyTorch module but is unused: it
    cancels exactly under training-mode BatchNorm.
    """
    del b
    B, I = x.shape
    O = w.shape[0]

    w_t = jnp.transpose(w)                      # (I, O) — glue reshape outside the kernel
    gb = jnp.stack([gamma, beta], axis=0)       # (2, O) single param stream

    # Pad output width to a multiple of 128 so the in-kernel store is lane-dense.
    P = ((O + I + 127) // 128) * 128

    kernel = functools.partial(_residual_kernel, out_features=O, in_features=I)
    vmem_spec = pl.BlockSpec(memory_space=pltpu.MemorySpace.VMEM)

    out_padded = pl.pallas_call(
        kernel,
        out_shape=jax.ShapeDtypeStruct((B, P), x.dtype),
        in_specs=[vmem_spec, vmem_spec, vmem_spec],
        out_specs=vmem_spec,
    )(x, w_t, gb)

    if P == O + I:
        return out_padded
    return out_padded[:, : O + I]

    # TODO(synk): when stacking several Residual layers (as CTGAN does), fuse
    # consecutive layers into one pallas_call with all weights VMEM-resident to
    # amortize launch + DMA cost.


def _reference(x, w, b, gamma, beta):
    h = x @ w.T + b
    mean = jnp.mean(h, axis=0, keepdims=True)
    var = jnp.mean((h - mean) ** 2, axis=0, keepdims=True)
    bn = (h - mean) / jnp.sqrt(var + EPS) * gamma + beta
    y = jnp.maximum(bn, 0.0)
    return jnp.concatenate([y, x], axis=1)


if __name__ == "__main__":
    B, I, O = 8, 32, 64   # small shapes: batch=8, in_features=32, out_features=64

    key = jax.random.PRNGKey(0)
    kx, kw, kb = jax.random.split(key, 3)

    x = jax.random.normal(kx, (B, I), dtype=jnp.float32)
    # Deterministic synthetic params, PyTorch Linear-like scale U(-1/sqrt(I), 1/sqrt(I)).
    bound = 1.0 / jnp.sqrt(jnp.float32(I))
    w = jax.random.uniform(kw, (O, I), dtype=jnp.float32, minval=-bound, maxval=bound)
    b = jax.random.uniform(kb, (O,), dtype=jnp.float32, minval=-bound, maxval=bound)
    gamma = jnp.ones((O,), dtype=jnp.float32)   # BatchNorm1d default affine init
    beta = jnp.zeros((O,), dtype=jnp.float32)

    out = residual_forward(x, w, b, gamma, beta)
    out = jax.block_until_ready(out)

    ref = _reference(x, w, b, gamma, beta)
    assert out.shape == (B, O + I)
    assert jnp.allclose(out, ref, atol=1e-4, rtol=1e-4)

    print("KERNEL_OK")
</pallas_src>

<mosaic_0001>
module attributes {stable_mosaic.version = 11 : i64} {
  func.func @_residual_kernel(%arg0: memref<8x32xf32, #tpu.memory_space<vmem>>, %arg1: memref<32x64xf32, #tpu.memory_space<vmem>>, %arg2: memref<2x64xf32, #tpu.memory_space<vmem>>, %arg3: memref<8x128xf32, #tpu.memory_space<vmem>>) attributes {dimension_semantics = [], scalar_prefetch = 0 : i64, scratch_operands = 0 : i64, tpu.core_type = #tpu.core_type<tc>} {
    %c0 = arith.constant 0 : index
    %c0_0 = arith.constant 0 : index
    %0 = vector.load %arg0[%c0, %c0_0] : memref<8x32xf32, #tpu.memory_space<vmem>>, vector<8x32xf32>
    %c0_1 = arith.constant 0 : index
    %c0_2 = arith.constant 0 : index
    %1 = vector.load %arg1[%c0_1, %c0_2] : memref<32x64xf32, #tpu.memory_space<vmem>>, vector<32x64xf32>
    %c0_3 = arith.constant 0 : index
    %c0_4 = arith.constant 0 : index
    %2 = vector.load %arg2[%c0_3, %c0_4] : memref<2x64xf32, #tpu.memory_space<vmem>>, vector<2x64xf32>
    %3 = vector.extract_strided_slice %2 {offsets = [0, 0], sizes = [1, 64], strides = [1, 1]} : vector<2x64xf32> to vector<1x64xf32>
    %4 = vector.extract_strided_slice %2 {offsets = [1, 0], sizes = [1, 64], strides = [1, 1]} : vector<2x64xf32> to vector<1x64xf32>
    %cst = arith.constant dense<0.000000e+00> : vector<8x64xf32>
    %5 = tpu.matmul %0, %1, %cst {dimension_numbers = #tpu.dot_dimension_numbers<[1], [0], [0], [1], [0, 0, 1, 1], [], []>} : vector<8x32xf32>, vector<32x64xf32>, vector<8x64xf32> -> vector<8x64xf32>
    %cst_5 = arith.constant dense<0.000000e+00> : vector<64xf32>
    %6 = vector.multi_reduction <add>, %5, %cst_5 [0] : vector<8x64xf32> to vector<64xf32>
    %7 = vector.shape_cast %6 : vector<64xf32> to vector<1x64xf32>
    %cst_6 = arith.constant 8.000000e+00 : f32
    %8 = vector.broadcast %cst_6 : f32 to vector<1x64xf32>
    %9 = arith.divf %7, %8 : vector<1x64xf32>
    %10 = vector.broadcast %9 : vector<1x64xf32> to vector<8x64xf32>
    %11 = arith.subf %5, %10 : vector<8x64xf32>
    %12 = arith.mulf %11, %11 : vector<8x64xf32>
    %cst_7 = arith.constant dense<0.000000e+00> : vector<64xf32>
    %13 = vector.multi_reduction <add>, %12, %cst_7 [0] : vector<8x64xf32> to vector<64xf32>
    %14 = vector.shape_cast %13 : vector<64xf32> to vector<1x64xf32>
    %cst_8 = arith.constant 8.000000e+00 : f32
    %15 = vector.broadcast %cst_8 : f32 to vector<1x64xf32>
    %16 = arith.divf %14, %15 : vector<1x64xf32>
    %cst_9 = arith.constant 9.99999974E-6 : f32
    %17 = vector.broadcast %cst_9 : f32 to vector<1x64xf32>
    %18 = arith.addf %16, %17 : vector<1x64xf32>
    %19 = math.rsqrt %18 : vector<1x64xf32>
    %20 = arith.mulf %3, %19 : vector<1x64xf32>
    %21 = vector.broadcast %20 : vector<1x64xf32> to vector<8x64xf32>
    %22 = arith.mulf %11, %21 : vector<8x64xf32>
    %23 = vector.broadcast %4 : vector<1x64xf32> to vector<8x64xf32>
    %24 = arith.addf %22, %23 : vector<8x64xf32>
    %cst_10 = arith.constant 0.000000e+00 : f32
    %25 = vector.broadcast %cst_10 : f32 to vector<8x64xf32>
    %26 = arith.maximumf %24, %25 : vector<8x64xf32>
    %cst_11 = arith.constant 0.000000e+00 : f32
    %27 = vector.broadcast %cst_11 : f32 to vector<8x32xf32>
    %28 = tpu.concatenate %26, %0, %27 in 1 : vector<8x64xf32>, vector<8x32xf32>, vector<8x32xf32> -> vector<8x128xf32>
    %c0_12 = arith.constant 0 : index
    %c0_13 = arith.constant 0 : index
    %29 = vector.load %arg3[%c0_12, %c0_13] : memref<8x128xf32, #tpu.memory_space<vmem>>, vector<8x128xf32>
    tpu.vector_store %arg3[%c0_12, %c0_13], %28 {strides = array<i32>} : memref<8x128xf32, #tpu.memory_space<vmem>>, vector<8x128xf32>,
    return
  }
}

</mosaic_0001>

<bundles_post_ra>
// kernel: tpu_custom_call.1
= control target key start
LH: loop header
LB: loop body
LE: loop exit
PB: predicated region body
PF: predicated region fallthrough
CT: control target
= control target key end

     0   :  { %8 = vsyncpa [#allocation3], 0  ;;  %s362_s0 = inlined_call_operand.hbm [shape: f32[8,32], index: 0, kind: input, shape index: {}]   ;;  %s363_s1 = inlined_call_operand.hbm [shape: f32[32,64], index: 1, kind: input, shape index: {}]   ;;  %s364_s2 = inlined_call_operand.vmem [shape: f32[2,64], index: 2, kind: input, shape index: {}]   ;;  %s365_s3 = inlined_call_operand.hbm [shape: f32[8,128], index: 3, kind: output, shape index: {}]  }
   0x1   :  { %9 = vsyncpa [#allocation6], 0 }
   0x2   :  { %10 = vsyncpa [#allocation4], 0  ;;  %s284_s12 = smov [#allocation2]   ;;  %s285_s14 = smov [#allocation5]  }
   0x3   :  { %s17_s13 = sshll.u32 %s284_s12, 4  ;;  %s26_s15 = sshll.u32 %s285_s14, 4  ;;  %s18_s13 = int_to_ptr.vmem [resolvable:$true] %s17_s13  ;;  %s313_s15 = int_to_ptr.vmem [resolvable:$true] %s26_s15 }
   0x4   :  { %s212_s18 = scalar_lea.hbm %s362_s0, 128 }
   0x5   :  { %p213_p0 = scmp.ne.s32.totalorder %s362_s0, %s212_s18  ;;  %p216_p1 = scmp.lt.u32.totalorder %s212_s18, %s362_s0 }
   0x7   :  { %p218_p2 = pnand %p216_p1, %p213_p0 }
   0x9   :  { %221 = shalt.err (!%p218_p2)
}
   0xa   :  { %s222_s23 = scalar_lea.vmem %s18_s13, 128  ;;  %p227_p4 = scmp.lt.s32.totalorder %s18_s13, %s18_s13 }
   0xb   :  { %p223_p3 = scmp.ne.s32.totalorder %s18_s13, %s222_s23  ;;  %p228_p5 = scmp.lt.s32.totalorder %s222_s23, %s222_s23 }
   0xd   :  { %p229_p6 = por %p228_p5, %p227_p4 }
   0xf   :  { %p230_p7 = pnand %p229_p6, %p223_p3 }
  0x11   :  { %233 = shalt.err (!%p230_p7)
}
  0x12   :  { %20 = dma.hbm_to_vmem [thread:$0]  %s362_s0, 128, %s18_s13, [#allocation3]  }
  0x13   :  { %s234_s28 = scalar_lea.hbm %s363_s1, 512 }
  0x14   :  { %p235_p8 = scmp.ne.s32.totalorder %s363_s1, %s234_s28  ;;  %p238_p9 = scmp.lt.u32.totalorder %s234_s28, %s363_s1 }
  0x16   :  { %p240_p10 = pnand %p238_p9, %p235_p8 }
  0x18   :  { %243 = shalt.err (!%p240_p10)
}
  0x19   :  { %s244_s6 = scalar_lea.vmem %s313_s15, 512  ;;  %p249_p12 = scmp.lt.s32.totalorder %s313_s15, %s313_s15 }
  0x1a   :  { %p245_p11 = scmp.ne.s32.totalorder %s313_s15, %s244_s6  ;;  %p250_p13 = scmp.lt.s32.totalorder %s244_s6, %s244_s6 }
  0x1c   :  { %p251_p0 = por %p250_p13, %p249_p12 }
  0x1e   :  { %p252_p1 = pnand %p251_p0, %p245_p11 }
  0x20   :  { %255 = shalt.err (!%p252_p1)
}
  0x21   :  { %s286_s0 = smov 128   ;;  %s287_s7 = smov 8  }
  0x22   :  { %32 = dma.hbm_to_vmem [thread:$0]  %s363_s1, 512, %s313_s15, [#allocation6], %s286_s0, %s286_s0, %s287_s7  }
  0x23   :  { %278 = dma.done.wait [#allocation3], 128  }
  0x24   :  { %279 = vsyncadd [#allocation3], 4294967168 }
  0x25   :  { %280 = dma.done.wait [#allocation6], 512  }
  0x26   :  { %281 = vsyncadd [#allocation6], 4294966784  ;;  %v288_v0 = vmov 0.0|0.0   ;;  %vm289_vm0 = vmmov 0   ;;  %v290_v1 = vmov 0.0   ;;  %v42_v2 = vld [vmem:[#allocation5] sm:$0xff]  ;;  %v144_v30 = vlaneseq }
  0x27   :  { %195 = vmatprep.subr.bf16.mxu0 %v288_v0  ;;  %192 = vmatprep.mubr.msk.f32.mxu0 %vm289_vm0, %v290_v1  ;;  %v43_v3 = vld [vmem:[#allocation5 + $0x8] sm:$0xff]  ;;  %v44_v4 = vld [vmem:[#allocation5 + $0x10] sm:$0xff]  ;;  %v45_v6 = vld [vmem:[#allocation5 + $0x18] sm:$0xff]  ;;  %s291_s10 = smov 64   ;;  %vm47_vm1 = vcmask 261120   ;;  %vm121_vm2 = vcmask 523264  }
  0x28   :  { %v196_v5 = vpack.c.bf16 %v43_v3, %v42_v2  ;;  %v41_v7 = vld [vmem:[#allocation2] sm:$0xff]  ;;  %v199_v8 = vpack.c.bf16 %v45_v6, %v44_v4  ;;  %v145_v31 = vshrl.u32 %v144_v30, 7  ;;  %s292_s12 = smov [#allocation7]   ;;  %vm159_vm3 = vcmask 785408  }
  0x29   :  { %155 = vrot.lane.b32.xlu0 %v41_v7, %s291_s10  ;;  %v46_v32 = vld [vmem:[%s364_s2] sm:$0x3]  ;;  %s168_s13 = sshll.u32 %s292_s12, 4  ;;  %s169_s13 = int_to_ptr.vmem [resolvable:$true] %s168_s13 }
  0x2a   :  { %197 = vmatpush3.bf16.msra.mxu0 %v196_v5  ;;  %v146_v33 = vsub.s32 0, %v145_v31  ;;  %v151_v34 = vsub.s32 1, %v145_v31  ;;  %s256_s14 = scalar_lea.vmem %s169_s13, 128  ;;  %p261_p3 = scmp.lt.s32.totalorder %s169_s13, %s169_s13 }
  0x2b   :  { %198 = vmatprep.subr.bf16.mxu0 %v288_v0  ;;  %p257_p2 = scmp.ne.s32.totalorder %s169_s13, %s256_s14  ;;  %p262_p4 = scmp.lt.s32.totalorder %s256_s14, %s256_s14 }
  0x2c   :  { %v152_v38 = vrot.slane %v46_v32, %v151_v34 }
  0x2d   :  { %p263_p5 = por %p262_p4, %p261_p3 }
  0x2e   :  { %200 = vmatpush3.bf16.msra.mxu0 %v199_v8 }
  0x2f   :  { %p264_p6 = pnand %p263_p5, %p257_p2 }
  0x31   :  { %193 = vmatmul.mubr.msk.f32.vlgmr.msra.gmra.mrb[0].mxu0 %vm47_vm1, %v41_v7 }
  0x9b   :  { %v156_v41 = vpop.permute.xlu0 %155 }
 0x104   :  { %v117_v9 = vpop.f32.mrb[0].mxu0 }
 0x105   :  { %v122_v10 = vsel %vm121_vm2, %v117_v9, 0.0  ;;  %v194_v11 = vpop.f32.mrb[1].mxu0 }
 0x106   :  { %v123_v12 = vrot.slane %v122_v10, 4 }
 0x108   :  { %v124_v13 = vadd.f32 %v123_v12, %v122_v10 }
 0x10a   :  { %v125_v14 = vrot.slane %v124_v13, 2 }
 0x10c   :  { %v126_v15 = vadd.f32 %v125_v14, %v124_v13 }
 0x10e   :  { %v127_v16 = vrot.slane %v126_v15, 1 }
 0x110   :  { %v128_v17 = vadd.f32 %v127_v16, %v126_v15 }
 0x112   :  { %v130_v18 = vmul.f32 0.125, %v128_v17 }
 0x114   :  { %v131_v19 = vsub.f32 %v117_v9, %v130_v18 }
 0x116   :  { %v132_v20 = vmul.f32 %v131_v19, %v131_v19 }
 0x118   :  { %v133_v21 = vsel %vm121_vm2, %v132_v20, 0.0 }
 0x119   :  { %v134_v22 = vrot.slane %v133_v21, 4 }
 0x11b   :  { %v135_v23 = vadd.f32 %v134_v22, %v133_v21 }
 0x11d   :  { %v136_v24 = vrot.slane %v135_v23, 2 }
 0x11f   :  { %v137_v25 = vadd.f32 %v136_v24, %v135_v23 }
 0x121   :  { %v138_v26 = vrot.slane %v137_v25, 1 }
 0x123   :  { %v139_v27 = vadd.f32 %v138_v26, %v137_v25 }
 0x125   :  { %v140_v28 = vmul.f32 0.125, %v139_v27 }
 0x127   :  { %v141_v29 = vadd.f32 1e-05, %v140_v28 }
 0x129   :  { %210 = vrsqrt.f32 %v141_v29 }
 0x133   :  { %v211_v35 = vpop.eup %210 }
 0x134   :  { %v143_v36 = vmul.f32 %v211_v35, %v46_v32 }
 0x136   :  { %v147_v37 = vrot.slane %v143_v36, %v146_v33 }
 0x138   :  { %v148_v39 = vmul.f32 %v147_v37, %v131_v19 }
 0x13a   :  { %v153_v40 = vadd.f32 %v152_v38, %v148_v39 }
 0x13c   :  { %v154_v42 = vmax.f32 %v153_v40, 0.0 }
 0x13e   :  { %v158_v43 = vsel %vm121_vm2, %v154_v42, %v156_v41 }
 0x13f   :  { %v160_v44 = vsel %vm159_vm3, %v158_v43, 0.0 }
 0x140   :  { %161 = vst [vmem:[#allocation7] sm:$0xff] %v160_v44 }
 0x141   :  { %267 = shalt.err (!%p264_p6)
}
 0x142   :  { %s268_s16 = scalar_lea.hbm %s365_s3, 128 }
 0x143   :  { %p269_p7 = scmp.ne.s32.totalorder %s365_s3, %s268_s16  ;;  %p272_p8 = scmp.lt.u32.totalorder %s268_s16, %s365_s3 }
 0x145   :  { %p274_p9 = pnand %p272_p8, %p269_p7 }
 0x147   :  { %277 = shalt.err (!%p274_p9)
}
 0x148   :  { %171 = dma.vmem_to_hbm [thread:$0]  %s169_s13, 128, %s365_s3, [#allocation4]  }
 0x149   :  { %282 = dma.done.wait [#allocation4], 128  }
 0x14a   :  { %283 = vsyncadd [#allocation4], 4294967168 }
 0x14b   :  { %175 = vsyncpa [#allocation3], 1 }
 0x14c   :  { %176 = vsyncpa [#allocation6], 1 }
 0x14d   :  { %177 = vsyncpa [#allocation4], 1 }

</bundles_post_ra>
